<compile_context>
chip_gen: v7x
topology: tpu7x:2x2x1
jax: 0.10.0
libtpu: 0.0.40
codegen_flags: <defaults>
</compile_context>

<pallas_src>
import functools
import math

import jax
import jax.numpy as jnp
from jax.experimental import pallas as pl
from jax.experimental.pallas import tpu as pltpu

_SUBLANES = 8
_LANES = 128
_MAX_TILE_LANES = 32 * 1024          # 8 x 32768 x f32 = 1 MiB per input block
_NUM_PARALLEL = 2                    # leading grid axis; uses both TCs on v7x
_SMALL_N_FALLBACK = _SUBLANES * _LANES  # below this, pure-jnp is faster

_STREAM_OK = (jnp.dtype(jnp.bfloat16), jnp.dtype(jnp.float16),
              jnp.dtype(jnp.float32))


def _ncnet_loss_kernel(gt_ref, sa_ref, sb_ref, out_ref, acc_ref, *,
                       neg_inv_n, tiles_per_core, num_valid_tiles, clamp_tail):
    p = pl.program_id(0)   # core slice (parallel)
    t = pl.program_id(1)   # column-tile within this slice (reduction)

    @pl.when(t == 0)
    def _init():
        acc_ref[...] = jnp.zeros_like(acc_ref)

    def _accumulate():
        # Stream at native width; upcast right before the math; acc stays f32.
        gt = gt_ref[...].astype(jnp.float32)
        sa = sa_ref[...].astype(jnp.float32)
        sb = sb_ref[...].astype(jnp.float32)
        # Hot loop: VPU-only lane-wise accumulate.  The cross-lane reduce and
        # the (-1/N) scale happen once per core slice in the epilogue.
        acc_ref[...] += gt * (sa + sb)

    if clamp_tail:
        # Odd logical tile count: the last core slice has one phantom
        # iteration whose block index was clamped in the index_map; skip it.
        pl.when(p * tiles_per_core + t < num_valid_tiles)(_accumulate)
    else:
        _accumulate()

    @pl.when(t == pl.num_programs(1) - 1)
    def _finalize():
        partial = jnp.sum(acc_ref[...]) * neg_inv_n
        out_ref[...] = jnp.broadcast_to(partial, out_ref.shape).astype(
            out_ref.dtype)


def ncnet_loss(correlation, gt_label, mean_score_A, mean_score_B, *,
               min_pallas_elems=_SMALL_N_FALLBACK):
    """Pallas implementation of NCNet_Loss.forward.

    `correlation` is unused (matches the PyTorch module) but kept for parity.
    """
    del correlation  # unused by the reference forward pass

    shp = jnp.broadcast_shapes(jnp.shape(gt_label), jnp.shape(mean_score_A),
                               jnp.shape(mean_score_B))
    n = int(math.prod(shp)) if len(shp) > 0 else 1

    if n == 0:
        # torch.mean over an empty tensor returns NaN.
        return jnp.float32(jnp.nan)

    if n < min_pallas_elems:
        # Small-N fast path: launch + prep overhead would dominate the
        # sub-microsecond reduction for the module's nominal (B,) inputs.
        gt = jnp.broadcast_to(jnp.asarray(gt_label), shp).astype(jnp.float32)
        sa = jnp.broadcast_to(jnp.asarray(mean_score_A), shp).astype(jnp.float32)
        sb = jnp.broadcast_to(jnp.asarray(mean_score_B), shp).astype(jnp.float32)
        return jnp.mean(-1.0 * gt * (sa + sb))

    # ---- Tiling ----------------------------------------------------------
    m0 = -(-n // _SUBLANES)                            # columns of the (8, M) view
    tile = min(_MAX_TILE_LANES, -(-m0 // _LANES) * _LANES)
    num_valid_tiles = -(-m0 // tile)                   # logical column tiles
    num_cores = _NUM_PARALLEL if num_valid_tiles >= _NUM_PARALLEL else 1
    tiles_per_core = -(-num_valid_tiles // num_cores)
    clamp_tail = tiles_per_core * num_cores != num_valid_tiles
    mpad = num_valid_tiles * tile                      # padded column count
    pad = _SUBLANES * mpad - n

    def _prep(x):
        x = jnp.broadcast_to(jnp.asarray(x), shp)
        if jnp.dtype(x.dtype) not in _STREAM_OK:
            x = x.astype(jnp.float32)    # keep bf16/f16 native, upcast in-kernel
        x = x.reshape(-1)
        if pad:
            # Zero pad: gt pads are 0, so padded lanes contribute exactly 0.
            # TODO(synk): for ragged n this is one extra HBM pass per input;
            # removable with in-kernel tail masking on the final tile.
            x = jnp.pad(x, (0, pad))
        return x.reshape(_SUBLANES, mpad)

    gt2 = _prep(gt_label)
    sa2 = _prep(mean_score_A)
    sb2 = _prep(mean_score_B)

    if clamp_tail:
        def col_idx(p, t):
            return (0, jnp.minimum(p * tiles_per_core + t, num_valid_tiles - 1))
    else:
        def col_idx(p, t):
            return (0, p * tiles_per_core + t)

    in_spec = pl.BlockSpec((_SUBLANES, tile), col_idx)
    # TODO(synk): on v7x, pipeline_mode=pl.Buffered(3) on the input specs can
    # further hide DMA issue jitter at 3.2 TB/s; kept at default double buffer.

    kernel = functools.partial(
        _ncnet_loss_kernel,
        neg_inv_n=-1.0 / n,
        tiles_per_core=tiles_per_core,
        num_valid_tiles=num_valid_tiles,
        clamp_tail=clamp_tail,
    )

    partials = pl.pallas_call(
        kernel,
        out_shape=jax.ShapeDtypeStruct((num_cores, _SUBLANES, _LANES),
                                       jnp.float32),
        grid=(num_cores, tiles_per_core),
        in_specs=[in_spec, in_spec, in_spec],
        out_specs=pl.BlockSpec((1, _SUBLANES, _LANES), lambda p, t: (p, 0, 0)),
        scratch_shapes=[pltpu.VMEM((_SUBLANES, tile), jnp.float32)],
        compiler_params=pltpu.CompilerParams(
            dimension_semantics=("parallel", "arbitrary"),
            vmem_limit_bytes=32 * 1024 * 1024),
    )(gt2, sa2, sb2)

    # Each core slice's output block is filled with its already-scaled partial.
    return jnp.sum(partials[:, 0, 0])


if __name__ == "__main__":
    key = jax.random.PRNGKey(0)
    k1, k2, k3, k4 = jax.random.split(key, 4)

    B, H, W = 2, 16, 16
    # correlation (unused by forward): 4-D correlation tensor (B, H*W, H, W)
    correlation = jax.random.normal(k1, (B, H * W, H, W), dtype=jnp.float32)
    gt_label = jnp.where(
        jax.random.bernoulli(k2, 0.5, (B,)), 1.0, -1.0).astype(jnp.float32)
    mean_score_A = jax.random.uniform(k3, (B,), dtype=jnp.float32)
    mean_score_B = jax.random.uniform(k4, (B,), dtype=jnp.float32)

    ref = jnp.mean(-1.0 * gt_label * (mean_score_A + mean_score_B))

    # Nominal path for the module's (B,) inputs (small-N fast path).
    loss_fast = jax.block_until_ready(
        ncnet_loss(correlation, gt_label, mean_score_A, mean_score_B))
    assert jnp.allclose(loss_fast, ref, atol=1e-6), (loss_fast, ref)

    # Force the Pallas kernel on the same small inputs.
    loss_small = jax.block_until_ready(
        ncnet_loss(correlation, gt_label, mean_score_A, mean_score_B,
                   min_pallas_elems=0))
    assert jnp.allclose(loss_small, ref, atol=1e-6), (loss_small, ref)

    # Larger, ragged N exercising: multi-tile streaming, odd logical tile
    # count (clamped + skipped phantom tile on the second core slice), zero
    # padding, and native-bf16 streaming for one of the scores.
    kb = jax.random.split(jax.random.PRNGKey(1), 3)
    n_big = (_SUBLANES * _MAX_TILE_LANES * 2
             + _SUBLANES * (_MAX_TILE_LANES // 2) + 37)
    gt_b = jnp.where(jax.random.bernoulli(kb[0], 0.5, (n_big,)), 1.0,
                     -1.0).astype(jnp.float32)
    sa_b = jax.random.uniform(
        kb[1], (n_big,), dtype=jnp.float32).astype(jnp.bfloat16)
    sb_b = jax.random.uniform(kb[2], (n_big,), dtype=jnp.float32)
    loss_b = jax.block_until_ready(ncnet_loss(None, gt_b, sa_b, sb_b))
    ref_b = jnp.mean(-1.0 * gt_b * (sa_b.astype(jnp.float32) + sb_b))
    assert jnp.allclose(loss_b, ref_b, atol=2e-5, rtol=1e-4), (loss_b, ref_b)

    print("KERNEL_OK")
</pallas_src>

<mosaic_0001>
module attributes {stable_mosaic.version = 11 : i64} {
  func.func @_ncnet_loss_kernel(%arg0: i32, %arg1: i32, %arg2: memref<8x128xf32, #tpu.memory_space<vmem>>, %arg3: memref<8x128xf32, #tpu.memory_space<vmem>>, %arg4: memref<8x128xf32, #tpu.memory_space<vmem>>, %arg5: memref<1x8x128xf32, #tpu.memory_space<vmem>>, %arg6: memref<8x128xf32, #tpu.memory_space<vmem>>) attributes {dimension_semantics = [#tpu.dimension_semantics<parallel>, #tpu.dimension_semantics<arbitrary>], iteration_bounds = array<i64: 1, 1>, scalar_prefetch = 0 : i64, scratch_operands = 1 : i64, tpu.core_type = #tpu.core_type<tc>, window_params = [{transform_indices = @transform_0, window_bounds = array<i64: 8, 128>}, {transform_indices = @transform_1, window_bounds = array<i64: 8, 128>}, {transform_indices = @transform_2, window_bounds = array<i64: 8, 128>}, {transform_indices = @transform_3, window_bounds = array<i64: 1, 8, 128>}]} {
    %c0_i32 = arith.constant 0 : i32
    %0 = arith.cmpi eq, %arg1, %c0_i32 : i32
    %1 = arith.extui %0 : i1 to i32
    %c0_i32_0 = arith.constant 0 : i32
    %2 = arith.cmpi ne, %1, %c0_i32_0 : i32
    scf.if %2 {
      %cst = arith.constant 0.000000e+00 : f32
      %14 = vector.broadcast %cst : f32 to vector<8x128xf32>
      %c0_12 = arith.constant 0 : index
      %c0_13 = arith.constant 0 : index
      %15 = vector.load %arg6[%c0_12, %c0_13] : memref<8x128xf32, #tpu.memory_space<vmem>>, vector<8x128xf32>
      tpu.vector_store %arg6[%c0_12, %c0_13], %14 {strides = array<i32>} : memref<8x128xf32, #tpu.memory_space<vmem>>, vector<8x128xf32>,
    } else {
    }
    %c0 = arith.constant 0 : index
    %c0_1 = arith.constant 0 : index
    %3 = vector.load %arg2[%c0, %c0_1] : memref<8x128xf32, #tpu.memory_space<vmem>>, vector<8x128xf32>
    %c0_2 = arith.constant 0 : index
    %c0_3 = arith.constant 0 : index
    %4 = vector.load %arg3[%c0_2, %c0_3] : memref<8x128xf32, #tpu.memory_space<vmem>>, vector<8x128xf32>
    %c0_4 = arith.constant 0 : index
    %c0_5 = arith.constant 0 : index
    %5 = vector.load %arg4[%c0_4, %c0_5] : memref<8x128xf32, #tpu.memory_space<vmem>>, vector<8x128xf32>
    %c0_6 = arith.constant 0 : index
    %c0_7 = arith.constant 0 : index
    %6 = vector.load %arg6[%c0_6, %c0_7] : memref<8x128xf32, #tpu.memory_space<vmem>>, vector<8x128xf32>
    %7 = arith.addf %4, %5 : vector<8x128xf32>
    %8 = arith.mulf %3, %7 : vector<8x128xf32>
    %9 = arith.addf %6, %8 : vector<8x128xf32>
    %c0_8 = arith.constant 0 : index
    %c0_9 = arith.constant 0 : index
    %10 = vector.load %arg6[%c0_8, %c0_9] : memref<8x128xf32, #tpu.memory_space<vmem>>, vector<8x128xf32>
    tpu.vector_store %arg6[%c0_8, %c0_9], %9 {strides = array<i32>} : memref<8x128xf32, #tpu.memory_space<vmem>>, vector<8x128xf32>,
    %c0_i32_10 = arith.constant 0 : i32
    %11 = arith.cmpi eq, %arg1, %c0_i32_10 : i32
    %12 = arith.extui %11 : i1 to i32
    %c0_i32_11 = arith.constant 0 : i32
    %13 = arith.cmpi ne, %12, %c0_i32_11 : i32
    scf.if %13 {
      %c0_12 = arith.constant 0 : index
      %c0_13 = arith.constant 0 : index
      %14 = vector.load %arg6[%c0_12, %c0_13] : memref<8x128xf32, #tpu.memory_space<vmem>>, vector<8x128xf32>
      %15 = vector.shape_cast %14 : vector<8x128xf32> to vector<1x8x128xf32>
      %cst = arith.constant dense<0.000000e+00> : vector<1xf32>
      %16 = vector.multi_reduction <add>, %15, %cst [1, 2] : vector<1x8x128xf32> to vector<1xf32>
      %17 = vector.shape_cast %16 : vector<1xf32> to vector<1x1x1xf32>
      %18 = vector.extract %17[0, 0, 0] : f32 from vector<1x1x1xf32>
      %cst_14 = arith.constant -5.000000e-01 : f32
      %19 = arith.mulf %18, %cst_14 : f32
      %20 = vector.broadcast %19 : f32 to vector<1x8x128xf32>
      %c0_15 = arith.constant 0 : index
      %c0_16 = arith.constant 0 : index
      %c0_17 = arith.constant 0 : index
      %21 = vector.load %arg5[%c0_15, %c0_16, %c0_17] : memref<1x8x128xf32, #tpu.memory_space<vmem>>, vector<1x8x128xf32>
      tpu.vector_store %arg5[%c0_15, %c0_16, %c0_17], %20 {strides = array<i32>} : memref<1x8x128xf32, #tpu.memory_space<vmem>>, vector<1x8x128xf32>,
    } else {
    }
    return
  }
  func.func @transform_0(%arg0: i32, %arg1: i32) -> (i32, i32) {
    %c1_i32 = arith.constant 1 : i32
    %0 = arith.muli %arg0, %c1_i32 : i32
    %1 = arith.addi %0, %arg1 : i32
    %c0_i32 = arith.constant 0 : i32
    %c0_i32_0 = arith.constant 0 : i32
    return %c0_i32, %1 : i32, i32
  }
  func.func @transform_1(%arg0: i32, %arg1: i32) -> (i32, i32) {
    %c1_i32 = arith.constant 1 : i32
    %0 = arith.muli %arg0, %c1_i32 : i32
    %1 = arith.addi %0, %arg1 : i32
    %c0_i32 = arith.constant 0 : i32
    %c0_i32_0 = arith.constant 0 : i32
    return %c0_i32, %1 : i32, i32
  }
  func.func @transform_2(%arg0: i32, %arg1: i32) -> (i32, i32) {
    %c1_i32 = arith.constant 1 : i32
    %0 = arith.muli %arg0, %c1_i32 : i32
    %1 = arith.addi %0, %arg1 : i32
    %c0_i32 = arith.constant 0 : i32
    %c0_i32_0 = arith.constant 0 : i32
    return %c0_i32, %1 : i32, i32
  }
  func.func @transform_3(%arg0: i32, %arg1: i32) -> (i32, i32, i32) {
    %c0_i32 = arith.constant 0 : i32
    %c0_i32_0 = arith.constant 0 : i32
    %c0_i32_1 = arith.constant 0 : i32
    return %arg0, %c0_i32, %c0_i32_0 : i32, i32, i32
  }
}

</mosaic_0001>

<bundles_post_ra>
// kernel: tpu_custom_call.1
= control target key start
LH: loop header
LB: loop body
LE: loop exit
PB: predicated region body
PF: predicated region fallthrough
CT: control target
= control target key end

     0   :  { %8 = vsyncpa [#allocation4], 0  ;;  %s279_s0 = inlined_call_operand.hbm [shape: f32[8,128], index: 0, kind: input, shape index: {}]   ;;  %s280_s1 = inlined_call_operand.hbm [shape: f32[8,128], index: 1, kind: input, shape index: {}]   ;;  %s281_s2 = inlined_call_operand.hbm [shape: f32[8,128], index: 2, kind: input, shape index: {}]   ;;  %s282_s3 = inlined_call_operand.hbm [shape: f32[1,8,128], index: 3, kind: output, shape index: {}]  }
   0x1   :  { %9 = vsyncpa [#allocation7], 0 }
   0x2   :  { %10 = vsyncpa [#allocation5], 0  ;;  %s207_s12 = smov [#allocation6]   ;;  %s208_s14 = smov [#allocation3]  }
   0x3   :  { %s33_s13 = sshll.u32 %s207_s12, 4  ;;  %s20_s15 = sshll.u32 %s208_s14, 4  ;;  %s34_s13 = int_to_ptr.vmem [resolvable:$true] %s33_s13  ;;  %s21_s15 = int_to_ptr.vmem [resolvable:$true] %s20_s15 }
   0x4   :  { %s113_s18 = scalar_lea.hbm %s280_s1, 128 }
   0x5   :  { %p114_p0 = scmp.ne.s32.totalorder %s280_s1, %s113_s18  ;;  %p117_p1 = scmp.lt.u32.totalorder %s113_s18, %s280_s1 }
   0x7   :  { %p119_p2 = pnand %p117_p1, %p114_p0 }
   0x9   :  { %122 = shalt.err (!%p119_p2)
}
   0xa   :  { %s123_s23 = scalar_lea.vmem %s34_s13, 128  ;;  %p128_p4 = scmp.lt.s32.totalorder %s34_s13, %s34_s13 }
   0xb   :  { %p124_p3 = scmp.ne.s32.totalorder %s34_s13, %s123_s23  ;;  %p129_p5 = scmp.lt.s32.totalorder %s123_s23, %s123_s23 }
   0xd   :  { %p130_p6 = por %p129_p5, %p128_p4 }
   0xf   :  { %p131_p7 = pnand %p130_p6, %p124_p3 }
  0x11   :  { %134 = shalt.err (!%p131_p7)
}
  0x12   :  { %36 = dma.hbm_to_vmem [thread:$0]  %s280_s1, 128, %s34_s13, [#allocation7]  }
  0x13   :  { %s135_s28 = scalar_lea.hbm %s279_s0, 128 }
  0x14   :  { %p136_p8 = scmp.ne.s32.totalorder %s279_s0, %s135_s28  ;;  %p139_p9 = scmp.lt.u32.totalorder %s135_s28, %s279_s0 }
  0x16   :  { %p141_p10 = pnand %p139_p9, %p136_p8 }
  0x18   :  { %144 = shalt.err (!%p141_p10)
}
  0x19   :  { %s145_s6 = scalar_lea.vmem %s21_s15, 128  ;;  %p150_p12 = scmp.lt.s32.totalorder %s21_s15, %s21_s15 }
  0x1a   :  { %p146_p11 = scmp.ne.s32.totalorder %s21_s15, %s145_s6  ;;  %p151_p13 = scmp.lt.s32.totalorder %s145_s6, %s145_s6 }
  0x1c   :  { %p152_p0 = por %p151_p13, %p150_p12 }
  0x1e   :  { %p153_p1 = pnand %p152_p0, %p146_p11 }
  0x20   :  { %156 = shalt.err (!%p153_p1)
}
  0x21   :  { %23 = dma.hbm_to_vmem [thread:$0]  %s279_s0, 128, %s21_s15, [#allocation4]  }
  0x22   :  { %s209_s8 = smov [#allocation8]   ;;  %s157_s12 = scalar_lea.hbm %s281_s2, 128 }
  0x23   :  { %s46_s9 = sshll.u32 %s209_s8, 4  ;;  %p158_p2 = scmp.ne.s32.totalorder %s281_s2, %s157_s12  ;;  %s47_s9 = int_to_ptr.vmem [resolvable:$true] %s46_s9 }
  0x24   :  { %p161_p3 = scmp.lt.u32.totalorder %s157_s12, %s281_s2 }
  0x26   :  { %p163_p4 = pnand %p161_p3, %p158_p2 }
  0x28   :  { %166 = shalt.err (!%p163_p4)
}
  0x29   :  { %s167_s18 = scalar_lea.vmem %s47_s9, 128  ;;  %p172_p6 = scmp.lt.s32.totalorder %s47_s9, %s47_s9 }
  0x2a   :  { %p168_p5 = scmp.ne.s32.totalorder %s47_s9, %s167_s18  ;;  %p173_p7 = scmp.lt.s32.totalorder %s167_s18, %s167_s18 }
  0x2c   :  { %p174_p8 = por %p173_p7, %p172_p6 }
  0x2e   :  { %p175_p9 = pnand %p174_p8, %p168_p5 }
  0x30   :  { %178 = shalt.err (!%p175_p9)
}
  0x31   :  { %49 = dma.hbm_to_vmem [thread:$0]  %s281_s2, 128, %s47_s9, [#allocation7]  }
  0x32   :  { %201 = dma.done.wait [#allocation4], 128  }
  0x33   :  { %202 = vsyncadd [#allocation4], 4294967168 }
  0x34   :  { %203 = dma.done.wait [#allocation7], 256  }
  0x35   :  { %204 = vsyncadd [#allocation7], 4294967040  ;;  %v67_v0 = vld [vmem:[#allocation3] sm:$0xff]  ;;  %v68_v1 = vld [vmem:[#allocation6] sm:$0xff]  ;;  %s210_s19 = smov [#allocation9]  }
  0x36   :  { %v69_v2 = vld [vmem:[#allocation8] sm:$0xff]  ;;  %s97_s2 = sshll.u32 %s210_s19, 4  ;;  %s98_s2 = int_to_ptr.vmem [resolvable:$true] %s97_s2 }
  0x37   :  { %v71_v3 = vadd.f32 %v69_v2, %v68_v1  ;;  %s179_s22 = scalar_lea.vmem %s98_s2, 128  ;;  %p184_p11 = scmp.lt.s32.totalorder %s98_s2, %s98_s2 }
  0x38   :  { %p180_p10 = scmp.ne.s32.totalorder %s98_s2, %s179_s22  ;;  %p185_p12 = scmp.lt.s32.totalorder %s179_s22, %s179_s22 }
  0x39   :  { %v72_v4 = vmul.f32 %v71_v3, %v67_v0 }
  0x3a   :  { %p186_p13 = por %p185_p12, %p184_p11 }
  0x3b   :  { %79 = vadd.xlane.f32.xlu0 %v72_v4 }
  0x3c   :  { %p187_p0 = pnand %p186_p13, %p180_p10 }
  0xc8   :  { %v80_v5 = vpop.xlane.xlu0 %79 }
  0xc9   :  { %v81_v6 = vrot.slane %v80_v5, 4 }
  0xcb   :  { %v82_v7 = vadd.f32 %v81_v6, %v80_v5 }
  0xcd   :  { %v83_v8 = vrot.slane %v82_v7, 2 }
  0xcf   :  { %v84_v9 = vadd.f32 %v83_v8, %v82_v7 }
  0xd1   :  { %v85_v10 = vrot.slane %v84_v9, 1 }
  0xd3   :  { %v86_v11 = vadd.f32 %v85_v10, %v84_v9 }
  0xd5   :  { %107 = vpush %v86_v11 }
 0x106   :  { %s108_s20 = spop %107 }
 0x107   :  { %s88_s21 = smul.f32 -0.5, %s108_s20 }
 0x109   :  { %v89_v12 = vstv %s88_s21 }
 0x10a   :  { %90 = vst [vmem:[#allocation9] sm:$0xff] %v89_v12 }
 0x10b   :  { %190 = shalt.err (!%p187_p0)
}
 0x10c   :  { %s191_s25 = scalar_lea.hbm %s282_s3, 128 }
 0x10d   :  { %p192_p1 = scmp.ne.s32.totalorder %s282_s3, %s191_s25  ;;  %p195_p2 = scmp.lt.u32.totalorder %s191_s25, %s282_s3 }
 0x10f   :  { %p197_p3 = pnand %p195_p2, %p192_p1 }
 0x111   :  { %200 = shalt.err (!%p197_p3)
}
 0x112   :  { %100 = dma.vmem_to_hbm [thread:$0]  %s98_s2, 128, %s282_s3, [#allocation5]  }
 0x113   :  { %205 = dma.done.wait [#allocation5], 128  }
 0x114   :  { %206 = vsyncadd [#allocation5], 4294967168 }
 0x115   :  { %104 = vsyncpa [#allocation4], 1 }
 0x116   :  { %105 = vsyncpa [#allocation7], 1 }
 0x117   :  { %106 = vsyncpa [#allocation5], 1 }

</bundles_post_ra>
